<compile_context>
chip_gen: v7x
topology: tpu7x:2x2x1
jax: 0.10.0
libtpu: 0.0.40
codegen_flags: <defaults>
</compile_context>

<pallas_src>
import functools

import jax
import jax.numpy as jnp
from jax import lax
from jax.experimental import pallas as pl
from jax.experimental.pallas import tpu as pltpu


def _round_up(v, m):
    return ((v + m - 1) // m) * m


def center_loss_kernel(x_ref, y_ref, scale_ref, centers_ref,
                       loss_ref, new_centers_ref, delta_acc,
                       *, nb_class, loss_weight, inv_bd):
    i = pl.program_id(0)
    nsteps = pl.num_programs(0)

    @pl.when(i == 0)
    def _init():
        loss_ref[...] = jnp.zeros_like(loss_ref)
        delta_acc[...] = jnp.zeros_like(delta_acc)

    x = x_ref[...].astype(jnp.float32)          # (TB, Dp)
    y = y_ref[...]                              # (TB, 1) int32; -1 marks pad rows
    scale = scale_ref[...]                      # (TB, 1) f32 = alpha/(appear+1e-6); 0 on pad

    TB = x.shape[0]
    C = nb_class

    # one-hot labels (padded rows with y = -1 become all-zero rows)
    class_ids = lax.broadcasted_iota(jnp.int32, (TB, C), 1)
    onehot = (y == class_ids)
    onehot_mxu = onehot.astype(centers_ref.dtype)        # MXU operand dtype

    # row gather of centers via MXU: (TB, C) @ (C, Dp) -> (TB, Dp), f32 acc
    centers_batch = jnp.dot(onehot_mxu, centers_ref[...],
                            preferred_element_type=jnp.float32)

    diff = centers_batch - x                              # (TB, Dp) f32

    # partial squared-error sum; scaled to the mean at the last step
    loss_ref[...] += jnp.sum(diff * diff, keepdims=True)

    # per-row scale (division precomputed in wrapper) then MXU scatter-add:
    # delta[c] += sum_{i in tile, y[i]=c} scaled[i]   == onehot^T @ scaled
    scaled = (diff * scale).astype(centers_ref.dtype)
    delta_acc[...] += lax.dot_general(
        onehot_mxu, scaled, (((0,), (0,)), ((), ())),
        preferred_element_type=jnp.float32)

    @pl.when(i == nsteps - 1)
    def _finalize():
        loss_ref[...] *= jnp.float32(loss_weight * inv_bd)
        new_centers_ref[...] = (
            centers_ref[...].astype(jnp.float32) - delta_acc[...]
        ).astype(new_centers_ref.dtype)


def center_loss2_forward(x, y, centers, *, loss_weight=0.01, alpha=0.05,
                         block_b=None):
    """Returns (loss_scalar, updated_centers)."""
    B, D = x.shape
    C, D2 = centers.shape
    assert D == D2
    y = y.reshape(B).astype(jnp.int32)

    # appear_times[i] = #occurrences of y[i] in y -> per-row scale, computed once
    # outside the kernel (tiny) so the kernel can be a single batch-tiled pass.
    counts = jnp.zeros((C,), jnp.float32).at[y].add(1.0)
    appear = counts[y]                                         # (B,)
    scale = (jnp.float32(alpha) / (appear + jnp.float32(1e-6)))

    # lane-dense last dim; batch padded to the tile size (pad rows are inert).
    Dp = _round_up(D, 128)
    if block_b is None:
        block_b = 256
    TB = _round_up(min(block_b, _round_up(B, 8)), 8)
    Bp = _round_up(B, TB)

    x_pad = jnp.zeros((Bp, Dp), x.dtype).at[:B, :D].set(x)
    centers_pad = jnp.zeros((C, Dp), centers.dtype).at[:, :D].set(centers)
    y_pad = jnp.full((Bp, 1), -1, jnp.int32).at[:B, 0].set(y)
    scale_pad = jnp.zeros((Bp, 1), jnp.float32).at[:B, 0].set(scale)

    kernel = functools.partial(
        center_loss_kernel, nb_class=C,
        loss_weight=float(loss_weight), inv_bd=1.0 / float(B * D))

    loss, new_centers = pl.pallas_call(
        kernel,
        out_shape=(jax.ShapeDtypeStruct((1, 1), jnp.float32),
                   jax.ShapeDtypeStruct((C, Dp), centers.dtype)),
        grid_spec=pltpu.PrefetchScalarGridSpec(
            num_scalar_prefetch=0,
            grid=(Bp // TB,),
            in_specs=[
                pl.BlockSpec((TB, Dp), lambda i: (i, 0)),   # x tile
                pl.BlockSpec((TB, 1), lambda i: (i, 0)),    # y tile
                pl.BlockSpec((TB, 1), lambda i: (i, 0)),    # scale tile
                pl.BlockSpec((C, Dp), lambda i: (0, 0)),    # centers (resident)
            ],
            out_specs=(
                pl.BlockSpec((1, 1), lambda i: (0, 0)),     # loss accumulator
                pl.BlockSpec((C, Dp), lambda i: (0, 0)),    # new centers
            ),
            scratch_shapes=[pltpu.VMEM((C, Dp), jnp.float32)],   # delta accumulator
        ),
        input_output_aliases={3: 1},   # centers_pad buffer reused for new_centers
        compiler_params=pltpu.CompilerParams(
            dimension_semantics=("arbitrary",)),
    )(x_pad, y_pad, scale_pad, centers_pad)
    return loss[0, 0], new_centers[:, :D]


def _reference(x, y, centers, loss_weight=0.01, alpha=0.05):
    centers_batch = centers[y]                               # (B, D)
    loss = loss_weight * jnp.mean((x - centers_batch) ** 2)
    diff = centers_batch - x
    counts = jnp.sum(y[:, None] == y[None, :], axis=1).astype(jnp.float32)
    scaled = alpha * diff / (counts[:, None] + 1e-6)
    delta = jnp.zeros_like(centers).at[y].add(scaled)
    return loss, centers - delta


if __name__ == "__main__":
    key = jax.random.PRNGKey(0)
    kx, ky, kc = jax.random.split(key, 3)

    B, C, D = 32, 4, 32           # batch, nb_class, dim (small test shapes)
    x = jax.random.normal(kx, (B, D), dtype=jnp.float32)
    y = jax.random.randint(ky, (B,), 0, C, dtype=jnp.int32)

    # Case 1: centers buffer as initialized by the module (zeros).
    centers_zero = jnp.zeros((C, D), dtype=jnp.float32)
    # Case 2: non-trivial centers (buffer after some updates) to exercise the gather.
    centers_rand = jax.random.normal(kc, (C, D), dtype=jnp.float32)

    ok = True
    for centers in (centers_zero, centers_rand):
        # block_b=8 forces a multi-step grid (4 batch tiles) even at this tiny B,
        # exercising the init / accumulate / finalize path.
        loss, new_centers = center_loss2_forward(
            x, y, centers, loss_weight=0.01, alpha=0.05, block_b=8)
        jax.block_until_ready((loss, new_centers))

        ref_loss, ref_centers = _reference(x, y, centers)
        ok &= bool(jnp.allclose(loss, ref_loss, rtol=1e-5, atol=1e-6))
        ok &= bool(jnp.allclose(new_centers, ref_centers, rtol=1e-5, atol=1e-6))

    assert ok, "mismatch against reference"
    print("KERNEL_OK")
</pallas_src>

<mosaic_0001>
module attributes {stable_mosaic.version = 11 : i64} {
  func.func @center_loss_kernel(%arg0: i32, %arg1: memref<8x128xf32, #tpu.memory_space<vmem>>, %arg2: memref<8x1xi32, #tpu.memory_space<vmem>>, %arg3: memref<8x1xf32, #tpu.memory_space<vmem>>, %arg4: memref<4x128xf32, #tpu.memory_space<vmem>>, %arg5: memref<1x1xf32, #tpu.memory_space<vmem>>, %arg6: memref<4x128xf32, #tpu.memory_space<vmem>>, %arg7: memref<4x128xf32, #tpu.memory_space<vmem>>) attributes {dimension_semantics = [#tpu.dimension_semantics<arbitrary>], iteration_bounds = array<i64: 4>, scalar_prefetch = 0 : i64, scratch_operands = 1 : i64, tpu.core_type = #tpu.core_type<tc>, window_params = [{transform_indices = @transform_0, window_bounds = array<i64: 8, 128>}, {transform_indices = @transform_1, window_bounds = array<i64: 8, 1>}, {transform_indices = @transform_2, window_bounds = array<i64: 8, 1>}, {pipeline_mode = #tpu.pipeline_mode<synchronous>, transform_indices = @transform_3, window_bounds = array<i64: 4, 128>}, {pipeline_mode = #tpu.pipeline_mode<synchronous>, transform_indices = @transform_4, window_bounds = array<i64: 1, 1>}, {pipeline_mode = #tpu.pipeline_mode<synchronous>, transform_indices = @transform_5, window_bounds = array<i64: 4, 128>}]} {
    %c0_i32 = arith.constant 0 : i32
    %0 = arith.cmpi eq, %arg0, %c0_i32 : i32
    %1 = arith.extui %0 : i1 to i32
    %c0_i32_0 = arith.constant 0 : i32
    %2 = arith.cmpi ne, %1, %c0_i32_0 : i32
    scf.if %2 {
      %cst_19 = arith.constant 0.000000e+00 : f32
      %32 = vector.broadcast %cst_19 : f32 to vector<1x1xf32>
      %c0_20 = arith.constant 0 : index
      %c0_21 = arith.constant 0 : index
      %33 = vector.load %arg5[%c0_20, %c0_21] : memref<1x1xf32, #tpu.memory_space<vmem>>, vector<1x1xf32>
      tpu.vector_store %arg5[%c0_20, %c0_21], %32 {strides = array<i32>} : memref<1x1xf32, #tpu.memory_space<vmem>>, vector<1x1xf32>,
      %cst_22 = arith.constant 0.000000e+00 : f32
      %34 = vector.broadcast %cst_22 : f32 to vector<4x128xf32>
      %c0_23 = arith.constant 0 : index
      %c0_24 = arith.constant 0 : index
      %35 = vector.load %arg7[%c0_23, %c0_24] : memref<4x128xf32, #tpu.memory_space<vmem>>, vector<4x128xf32>
      tpu.vector_store %arg7[%c0_23, %c0_24], %34 {strides = array<i32>} : memref<4x128xf32, #tpu.memory_space<vmem>>, vector<4x128xf32>,
    } else {
    }
    %c0 = arith.constant 0 : index
    %c0_1 = arith.constant 0 : index
    %3 = vector.load %arg1[%c0, %c0_1] : memref<8x128xf32, #tpu.memory_space<vmem>>, vector<8x128xf32>
    %c0_2 = arith.constant 0 : index
    %c0_3 = arith.constant 0 : index
    %4 = vector.load %arg2[%c0_2, %c0_3] : memref<8x1xi32, #tpu.memory_space<vmem>>, vector<8x1xi32>
    %c0_4 = arith.constant 0 : index
    %c0_5 = arith.constant 0 : index
    %5 = vector.load %arg3[%c0_4, %c0_5] : memref<8x1xf32, #tpu.memory_space<vmem>>, vector<8x1xf32>
    %6 = tpu.iota {dimensions = array<i32: 1>} : vector<8x4xi32>
    %7 = vector.broadcast %4 : vector<8x1xi32> to vector<8x4xi32>
    %8 = arith.cmpi eq, %7, %6 : vector<8x4xi32>
    %9 = arith.extui %8 : vector<8x4xi1> to vector<8x4xi32>
    %10 = arith.sitofp %9 : vector<8x4xi32> to vector<8x4xf32>
    %c0_6 = arith.constant 0 : index
    %c0_7 = arith.constant 0 : index
    %11 = vector.load %arg4[%c0_6, %c0_7] : memref<4x128xf32, #tpu.memory_space<vmem>>, vector<4x128xf32>
    %cst = arith.constant dense<0.000000e+00> : vector<8x128xf32>
    %12 = tpu.matmul %10, %11, %cst {dimension_numbers = #tpu.dot_dimension_numbers<[1], [0], [0], [1], [0, 0, 1, 1], [], []>} : vector<8x4xf32>, vector<4x128xf32>, vector<8x128xf32> -> vector<8x128xf32>
    %13 = arith.subf %12, %3 : vector<8x128xf32>
    %c0_8 = arith.constant 0 : index
    %c0_9 = arith.constant 0 : index
    %14 = vector.load %arg5[%c0_8, %c0_9] : memref<1x1xf32, #tpu.memory_space<vmem>>, vector<1x1xf32>
    %15 = arith.mulf %13, %13 : vector<8x128xf32>
    %16 = vector.shape_cast %15 : vector<8x128xf32> to vector<1x8x128xf32>
    %cst_10 = arith.constant dense<0.000000e+00> : vector<1xf32>
    %17 = vector.multi_reduction <add>, %16, %cst_10 [1, 2] : vector<1x8x128xf32> to vector<1xf32>
    %18 = vector.shape_cast %17 : vector<1xf32> to vector<1x1x1xf32>
    %19 = vector.extract %18[0, 0, 0] : f32 from vector<1x1x1xf32>
    %20 = vector.broadcast %19 : f32 to vector<1x1xf32>
    %21 = arith.addf %14, %20 : vector<1x1xf32>
    %c0_11 = arith.constant 0 : index
    %c0_12 = arith.constant 0 : index
    %22 = vector.load %arg5[%c0_11, %c0_12] : memref<1x1xf32, #tpu.memory_space<vmem>>, vector<1x1xf32>
    tpu.vector_store %arg5[%c0_11, %c0_12], %21 {strides = array<i32>} : memref<1x1xf32, #tpu.memory_space<vmem>>, vector<1x1xf32>,
    %23 = vector.broadcast %5 : vector<8x1xf32> to vector<8x128xf32>
    %24 = arith.mulf %13, %23 : vector<8x128xf32>
    %c0_13 = arith.constant 0 : index
    %c0_14 = arith.constant 0 : index
    %25 = vector.load %arg7[%c0_13, %c0_14] : memref<4x128xf32, #tpu.memory_space<vmem>>, vector<4x128xf32>
    %cst_15 = arith.constant dense<0.000000e+00> : vector<4x128xf32>
    %26 = tpu.matmul %10, %24, %cst_15 {dimension_numbers = #tpu.dot_dimension_numbers<[0], [0], [1], [1], [0, 1, 1, 1], [], []>} : vector<8x4xf32>, vector<8x128xf32>, vector<4x128xf32> -> vector<4x128xf32>
    %27 = arith.addf %25, %26 : vector<4x128xf32>
    %c0_16 = arith.constant 0 : index
    %c0_17 = arith.constant 0 : index
    %28 = vector.load %arg7[%c0_16, %c0_17] : memref<4x128xf32, #tpu.memory_space<vmem>>, vector<4x128xf32>
    tpu.vector_store %arg7[%c0_16, %c0_17], %27 {strides = array<i32>} : memref<4x128xf32, #tpu.memory_space<vmem>>, vector<4x128xf32>,
    %c3_i32 = arith.constant 3 : i32
    %29 = arith.cmpi eq, %arg0, %c3_i32 : i32
    %30 = arith.extui %29 : i1 to i32
    %c0_i32_18 = arith.constant 0 : i32
    %31 = arith.cmpi ne, %30, %c0_i32_18 : i32
    scf.if %31 {
      %c0_19 = arith.constant 0 : index
      %c0_20 = arith.constant 0 : index
      %32 = vector.load %arg5[%c0_19, %c0_20] : memref<1x1xf32, #tpu.memory_space<vmem>>, vector<1x1xf32>
      %cst_21 = arith.constant 9.76562478E-6 : f32
      %33 = vector.broadcast %cst_21 : f32 to vector<1x1xf32>
      %34 = arith.mulf %32, %33 : vector<1x1xf32>
      %c0_22 = arith.constant 0 : index
      %c0_23 = arith.constant 0 : index
      %35 = vector.load %arg5[%c0_22, %c0_23] : memref<1x1xf32, #tpu.memory_space<vmem>>, vector<1x1xf32>
      tpu.vector_store %arg5[%c0_22, %c0_23], %34 {strides = array<i32>} : memref<1x1xf32, #tpu.memory_space<vmem>>, vector<1x1xf32>,
      %c0_24 = arith.constant 0 : index
      %c0_25 = arith.constant 0 : index
      %36 = vector.load %arg4[%c0_24, %c0_25] : memref<4x128xf32, #tpu.memory_space<vmem>>, vector<4x128xf32>
      %c0_26 = arith.constant 0 : index
      %c0_27 = arith.constant 0 : index
      %37 = vector.load %arg7[%c0_26, %c0_27] : memref<4x128xf32, #tpu.memory_space<vmem>>, vector<4x128xf32>
      %38 = arith.subf %36, %37 : vector<4x128xf32>
      %c0_28 = arith.constant 0 : index
      %c0_29 = arith.constant 0 : index
      %39 = vector.load %arg6[%c0_28, %c0_29] : memref<4x128xf32, #tpu.memory_space<vmem>>, vector<4x128xf32>
      tpu.vector_store %arg6[%c0_28, %c0_29], %38 {strides = array<i32>} : memref<4x128xf32, #tpu.memory_space<vmem>>, vector<4x128xf32>,
    } else {
    }
    return
  }
  func.func @transform_0(%arg0: i32) -> (i32, i32) {
    %c0_i32 = arith.constant 0 : i32
    %c0_i32_0 = arith.constant 0 : i32
    return %arg0, %c0_i32 : i32, i32
  }
  func.func @transform_1(%arg0: i32) -> (i32, i32) {
    %c0_i32 = arith.constant 0 : i32
    %c0_i32_0 = arith.constant 0 : i32
    return %arg0, %c0_i32 : i32, i32
  }
  func.func @transform_2(%arg0: i32) -> (i32, i32) {
    %c0_i32 = arith.constant 0 : i32
    %c0_i32_0 = arith.constant 0 : i32
    return %arg0, %c0_i32 : i32, i32
  }
  func.func @transform_3(%arg0: i32) -> (i32, i32) {
    %c0_i32 = arith.constant 0 : i32
    %c0_i32_0 = arith.constant 0 : i32
    %c0_i32_1 = arith.constant 0 : i32
    return %c0_i32, %c0_i32_0 : i32, i32
  }
  func.func @transform_4(%arg0: i32) -> (i32, i32) {
    %c0_i32 = arith.constant 0 : i32
    %c0_i32_0 = arith.constant 0 : i32
    %c0_i32_1 = arith.constant 0 : i32
    return %c0_i32, %c0_i32_0 : i32, i32
  }
  func.func @transform_5(%arg0: i32) -> (i32, i32) {
    %c0_i32 = arith.constant 0 : i32
    %c0_i32_0 = arith.constant 0 : i32
    %c0_i32_1 = arith.constant 0 : i32
    return %c0_i32, %c0_i32_0 : i32, i32
  }
}

</mosaic_0001>

<bundles_post_ra>
// kernel: tpu_custom_call.1
= control target key start
LH: loop header
LB: loop body
LE: loop exit
PB: predicated region body
PF: predicated region fallthrough
CT: control target
= control target key end

     0   :  { %11 = vsyncpa [#allocation4], 0  ;;  %s927_s0 = inlined_call_operand.vmem [shape: f32[32,128], index: 0, kind: input, shape index: {}]   ;;  %s928_s1 = inlined_call_operand.vmem [shape: s32[32,1], index: 1, kind: input, shape index: {}]   ;;  %s929_s2 = inlined_call_operand.vmem [shape: f32[32,1], index: 2, kind: input, shape index: {}]   ;;  %s930_s3 = inlined_call_operand.hbm [shape: f32[4,128], index: 3, kind: input, shape index: {}, may-alias: {3,5}]   ;;  %s931_s4 = inlined_call_operand.hbm [shape: f32[1,1], index: 4, kind: output, shape index: {0}]   ;;  %s932_s5 = inlined_call_operand.hbm [shape: f32[4,128], index: 5, kind: output, shape index: {1}, may-alias: {3,5}]  }
   0x1   :  { %12 = vsyncpa [#allocation5], 0 }
   0x2   :  { %13 = vsyncpa [#allocation8], 0  ;;  %s809_s18 = smov 0  }
   0x3 LB: > { %s815_s19 = sadd.s32 4294967295, %s770_s18   ;;  %p598_p0 = scmp.ge.s32.totalorder %s770_s18, 1  ;;  %s770_s18 = sphi %s809_s18, %s19_s18  }
   0x4   : > { %p165_p1 = scmp.lt.s32.totalorder %s770_s18, 5  ;;  %p933_p4 = scmp.eq.s32.totalorder %s815_s19, 0 }
   0x5   : > { %s772_s21 = smov [#allocation3]   ;;  %s672_s26 = scalar_lea.hbm %s930_s3, 64 }
   0x6   : > { %p820_p3 = pnand %p598_p0, %p165_p1  ;;  %s178_s22 = sshll.u32 %s772_s21, 4  ;;  %s179_s22 = int_to_ptr.vmem [resolvable:$true] %s178_s22 }
   0x7   : > { %p673_p7 = scmp.ne.s32.totalorder %s930_s3, %s672_s26  ;;  %p679_p11 = scmp.lt.u32.totalorder %s672_s26, %s930_s3 }
   0x8   : > { %s935_s20 = scalar_select %p820_p3, 1, 0 }
   0x9   : > { %p646_p5 = pneg %p820_p3 }
   0xb   : > { %p829_p6 = pnand %p933_p4, %p646_p5 }
   0xd   : > { %p674_p8 = pneg %p829_p6 }
   0xf   : > { %p675_p9 = pnand %p674_p8, %p673_p7 }
  0x11   : > { %p676_p10 = pneg %p675_p9 }
  0x13   : > { %p681_p12 = pnand %p679_p11, %p676_p10 }
  0x15   : > { %684 = shalt.err (!%p681_p12)
}
  0x16   : > { %s685_s6 = scalar_lea.vmem %s179_s22, 64  ;;  %p693_p5 = scmp.lt.s32.totalorder %s179_s22, %s179_s22 }
  0x17   : > { %p686_p13 = scmp.ne.s32.totalorder %s179_s22, %s685_s6  ;;  %p694_p2 = scmp.lt.s32.totalorder %s685_s6, %s685_s6 }
  0x19   : > { %p688_p0 = pnand %p686_p13, %p674_p8  ;;  %p695_p4 = por %p694_p2, %p693_p5 }
  0x1b   : > { %p689_p1 = pneg %p688_p0 }
  0x1d   : > { %p696_p3 = pnand %p695_p4, %p689_p1 }
  0x1f   : > { %699 = shalt.err (!%p696_p3)
}
  0x20   : > { %649 = dma.hbm_to_vmem [thread:$0]  (!%p829_p6), %s930_s3, 64, %s179_s22, [#allocation4]  }
  0x21   : > { %p937_p7 = scmp.ne.s32.totalorder %s935_s20, 0 }
  0x22   : > { %p938_p9 = scmp.eq.s32.totalorder (!%p937_p7), %s815_s19, 0 }
  0x23   : > { %212 = sbr.rel (%p937_p7) target bundleno = 675 (0x2a3), region = 36 }
  0x2a   : > { %757 = dma.done.wait (%p938_p9), [#allocation4], 64   ;;  %p939_p8 = pmov %p938_p9 }
  0x2b   : > { %p242_p2 = scmp.lt.s32.totalorder %s815_s19, 3  ;;  %p940_p3 = scmp.ne.s32.totalorder %s815_s19, 0 }
  0x2c   : > { %759 = vsyncadd (%p939_p8), [#allocation4], 4294967232  ;;  %vm258_vm0 = vcmask (!%p940_p3), 0   ;;  %v773_v0 = vmov (!%p940_p3), 0.0  }
  0x2d   : > { %s243_s9 = scalar_select %p242_p2, %s815_s19, 3 }
  0x2e   : > { %257 = sbr.rel (%p940_p3) target bundleno = 53 (0x35), region = 44  ;;  %259 = vst.msk [vmem:[#allocation6] sm:$0x1] (!%p940_p3), %vm258_vm0, %v773_v0  ;;  %260 = vst [vmem:[#allocation2] sm:$0xf] (!%p940_p3), %v773_v0 }
  0x2f   : > { %s857_s10 = sshll.u32 %s243_s9, 3 }
  0x30   : > { %s245_s13 = scalar_lea.vmem %s927_s0, %s857_s10  ;;  %s249_s16 = scalar_lea.vmem %s928_s1, %s857_s10 }
  0x31   : > { %s253_s21 = scalar_lea.vmem %s929_s2, %s857_s10 }
  0x35 PF: > { %v262_v1 = vld [vmem:[%s249_s16] sm:$0xff]  ;;  %v774_v2 = vmov 0   ;;  %v775_v3 = vmov 0.0   ;;  %vm277_vm1 = vcmask 1043456   ;;  %vm776_vm2 = vmmov 0   ;;  %p611_p4 = scmp.ne.s32.totalorder %s815_s19, 3 }
  0x36   : > { %671 = vset.pattern.permute.xlu0 %v774_v2  ;;  %622 = vmatprep.subr.mxu0 %v775_v3  ;;  %v272_v4 = vld [vmem:[#allocation3] sm:$0xf]  ;;  %v264_v6 = vlaneseq  ;;  %vm273_vm3 = vcmask 31744   ;;  %vm406_vm5 = vcmask 64512   ;;  %v352_v25 = vld [vmem:[#allocation6] sm:$0x1] }
  0x37   : > { %267 = vperm.xlu0 %671, %v262_v1   ;;  %v263_v5 = vld [vmem:[%s253_s21] sm:$0xff]  ;;  %623 = vmatpush3.msk.msra.mxu0 %vm277_vm1, %v272_v4  ;;  %vm365_vm6 = vcmask 0  }
  0x38   : > { %624 = vmatprep.mubr.msk.f32.mxu0 %vm776_vm2, %v775_v3  ;;  %627 = vmatprep.subr.mxu1 %v775_v3  ;;  %v265_v7 = vand.u32 127, %v264_v6  ;;  %v261_v10 = vld [vmem:[%s245_s13] sm:$0xff] }
  0x39   : > { %629 = vmatprep.mubr.msk.f32.mxu1 %vm776_vm2, %v775_v3  ;;  %v373_v28 = vld [vmem:[#allocation2] sm:$0xf]  ;;  %v489_v33 = vld [vmem:[#allocation3] sm:$0xf] (!%p611_p4) }
  0x3b   : > { %369 = vperm.xlu0 %671, %v263_v5  }
  0xb6   : > { %v268_v8 = vpop.permute.xlu0 %267 }
  0xb7   : > { %vm269_vm4 = vcmp.eq.s32.totalorder %v268_v8, %v265_v7 }
  0xb8   : > { %v607_v9 = vsel %vm269_vm4, 1.0, %v775_v3 }
  0xb9   : > { %374 = vxpose.xlu1.b32.start.end [1/1] (short) (narrow) %v607_v9, 8  ;;  %625 = vmatmul.mubr.msk.f32.vlgmr.msra.gmra.mrb[0].mxu0 %vm273_vm3, %v607_v9 }
  0xba   : > { %v370_v14 = vpop.permute.xlu0 %369 }
 0x139   : > { %v390_v15 = vpop.trf.xlu1 }
 0x18c   : > { %v347_v11 = vpop.f32.mrb[0].mxu0 }
 0x18d   : > { %v351_v12 = vsub.f32 %v347_v11, %v261_v10  ;;  %v626_v13 = vpop.f32.mrb[1].mxu0 }
 0x18f   : > { %v372_v16 = vmul.f32 %v370_v14, %v351_v12  ;;  %v353_v17 = vmul.f32 %v351_v12, %v351_v12 }
 0x191   : > { %628 = vmatpush3.msra.mxu1 %v372_v16  ;;  %354 = vadd.xlane.f32.xlu1 %v353_v17 }
 0x192   : > { %630 = vmatmul.mubr.msk.f32.vlgmr.msra.gmra.mrb[0].mxu1 %vm406_vm5, %v390_v15 }
 0x21e   : > { %v355_v18 = vpop.xlane.xlu1 %354 }
 0x21f   : > { %v356_v19 = vrot.slane %v355_v18, 4 }
 0x221   : > { %v357_v20 = vadd.f32 %v356_v19, %v355_v18 }
 0x223   : > { %v358_v21 = vrot.slane %v357_v20, 2 }
 0x225   : > { %v359_v22 = vadd.f32 %v358_v21, %v357_v20 }
 0x227   : > { %v360_v23 = vrot.slane %v359_v22, 1 }
 0x229   : > { %v361_v24 = vadd.f32 %v360_v23, %v359_v22 }
 0x22b   : > { %632 = vpush %v361_v24 }
 0x25c   : > { %s633_s24 = spop %632 }
 0x25d   : > { %v363_v26 = vstv %s633_s24 }
 0x25e   : > { %v364_v27 = vadd.f32 %v363_v26, %v352_v25 }
 0x260   : > { %366 = vst.msk [vmem:[#allocation6] sm:$0x1] %vm365_vm6, %v364_v27 }
 0x262   : > { %485 = sbr.rel (%p611_p4) target bundleno = 627 (0x273), region = 48 }
 0x265   : > { %v476_v29 = vpop.f32.mrb[0].mxu1 }
 0x266   : > { %v480_v30 = vadd.f32 %v476_v29, %v373_v28  ;;  %v631_v31 = vpop.f32.mrb[1].mxu1 }
 0x267   : > { %v486_v32 = vld [vmem:[#allocation6] sm:$0x1] (!%p611_p4) }
 0x268   : > { %481 = vst [vmem:[#allocation2] sm:$0xf] %v480_v30  ;;  %v487_v35 = vmul.f32 (!%p611_p4), 9.765625e-06, %v486_v32 }
 0x26a   : > { %488 = vst.msk [vmem:[#allocation6] sm:$0x1] %vm365_vm6, %v487_v35 }
 0x26f   : > { %v490_v34 = vld [vmem:[#allocation2] sm:$0xf] }
 0x270   : > { %v491_v36 = vsub.f32 %v489_v33, %v490_v34 }
 0x272   : > { %492 = vst [vmem:[#allocation7] sm:$0xf] %v491_v36 }
 0x273 PF: > { %p652_p6 = scmp.eq.s32.totalorder %s815_s19, 3  ;;  %s777_s25 = smov [#allocation6]  }
 0x274   : > { %s500_s26 = sshll.u32 %s777_s25, 4  ;;  %s778_s27 = smov [#allocation7]   ;;  %s501_s26 = int_to_ptr.vmem [resolvable:$true] %s500_s26 }
 0x275   : > { %s511_s28 = sshll.u32 %s778_s27, 4  ;;  %s700_s29 = scalar_lea.vmem %s501_s26, 16  ;;  %s512_s28 = int_to_ptr.vmem [resolvable:$true] %s511_s28 }
 0x276   : > { %p701_p10 = scmp.ne.s32.totalorder %s501_s26, %s700_s29  ;;  %s706_s30 = scalar_lea.vmem %s501_s26, 32 }
 0x277   : > { %p707_p13 = scmp.lt.s32.totalorder %s501_s26, %s501_s26  ;;  %p708_p0 = scmp.lt.s32.totalorder %s706_s30, %s700_s29 }
 0x278   : > { %p702_p11 = pnand %p701_p10, %p652_p6 }
 0x279   : > { %p709_p1 = por %p708_p0, %p707_p13 }
 0x27a   : > { %p703_p12 = pneg %p702_p11 }
 0x27c   : > { %p710_p5 = pnand %p709_p1, %p703_p12 }
 0x27e   : > { %713 = shalt.err (!%p710_p5)
}
 0x27f   : > { %s714_s8 = scalar_lea.hbm %s931_s4, 16 }
 0x280   : > { %p715_p7 = scmp.ne.s32.totalorder %s931_s4, %s714_s8  ;;  %p720_p2 = scmp.lt.u32.totalorder %s714_s8, %s931_s4 }
 0x282   : > { %p716_p9 = pnand %p715_p7, %p652_p6 }
 0x284   : > { %p717_p8 = pneg %p716_p9 }
 0x286   : > { %p722_p3 = pnand %p720_p2, %p717_p8 }
 0x288   : > { %725 = shalt.err (!%p722_p3)
}
 0x289   : > { %639 = dma.vmem_to_hbm [thread:$0]  (%p652_p6), %s501_s26, 16, %s931_s4, [#allocation5]  }
 0x28a   : > { %s726_s15 = scalar_lea.vmem %s512_s28, 64  ;;  %p733_p12 = scmp.lt.s32.totalorder %s512_s28, %s512_s28 }
 0x28b   : > { %p727_p4 = scmp.ne.s32.totalorder %s512_s28, %s726_s15  ;;  %p734_p13 = scmp.lt.s32.totalorder %s726_s15, %s726_s15 }
 0x28d   : > { %p728_p10 = pnand %p727_p4, %p652_p6  ;;  %p735_p0 = por %p734_p13, %p733_p12 }
 0x28f   : > { %p729_p11 = pneg %p728_p10 }
 0x291   : > { %p736_p1 = pnand %p735_p0, %p729_p11 }
 0x293   : > { %739 = shalt.err (!%p736_p1)
}
 0x294   : > { %s740_s20 = scalar_lea.hbm %s932_s5, 64 }
 0x295   : > { %p741_p5 = scmp.ne.s32.totalorder %s932_s5, %s740_s20  ;;  %p746_p8 = scmp.lt.u32.totalorder %s740_s20, %s932_s5 }
 0x297   : > { %p742_p7 = pnand %p741_p5, %p652_p6 }
 0x299   : > { %p743_p9 = pneg %p742_p7 }
 0x29b   : > { %p748_p2 = pnand %p746_p8, %p743_p9 }
 0x29d   : > { %751 = shalt.err (!%p748_p2)
}
 0x29e   : > { %641 = dma.vmem_to_hbm [thread:$0]  (%p652_p6), %s512_s28, 64, %s932_s5, [#allocation8]  }
 0x29f   : > { %761 = dma.done.wait (%p652_p6), [#allocation5], 16  }
 0x2a0   : > { %763 = vsyncadd (%p652_p6), [#allocation5], 4294967280 }
 0x2a1   : > { %765 = dma.done.wait (%p652_p6), [#allocation8], 64  }
 0x2a2   : > { %767 = vsyncadd (%p652_p6), [#allocation8], 4294967232 }
 0x2a3 PF: > { %s19_s18 = sadd.s32 1, %s770_s18  }
 0x2a4   : > { %p16_p3 = scmp.ge.s32.totalorder %s19_s18, 6  }
 0x2a6   :  { %18 = sbr.rel (!%p16_p3) target bundleno = 3 (0x3), region = 90 }
 0x2ad   :  { %528 = vsyncpa [#allocation4], 1 }
 0x2ae   :  { %530 = vsyncpa [#allocation4 + $0x1], 1 }
 0x2af   :  { %531 = vsyncpa [#allocation5], 1 }
 0x2b0   :  { %533 = vsyncpa [#allocation5 + $0x1], 1 }
 0x2b1   :  { %534 = vsyncpa [#allocation8], 1 }

</bundles_post_ra>
